<compile_context>
chip_gen: v7x
topology: tpu7x:2x2x1
jax: 0.10.0
libtpu: 0.0.40
codegen_flags: <defaults>
</compile_context>

<pallas_src>
import jax
import jax.numpy as jnp
import numpy as np
from jax.experimental import pallas as pl
from jax.experimental.pallas import tpu as pltpu


def _round_up(a, m):
    return ((a + m - 1) // m) * m


def _pick_tile(B, N, itemsize, n_streams, *, budget_bytes=8 << 20, tb_cap=2048):
    """Pick a batch tile so double-buffered blocks + f32 temps fit default VMEM."""
    sub = 8 if itemsize >= 4 else (16 if itemsize == 2 else 32)
    # Per batch row: n_streams double-buffered (tb, N) blocks + ~3 f32 temps.
    per_row = N * 4 * (2 * n_streams + 3)
    tb = budget_bytes // max(per_row, 1)
    tb = max(sub, min(int(tb), tb_cap, _round_up(B, sub)))
    return max(sub, (tb // sub) * sub)


def _repair_kernel_shared(sums_ref, x_ref, xmin_ref, xmax_ref, X_ref, o_ref):
    """Bounds shared across the batch: (1, N) resident blocks + SMEM totals."""
    x = x_ref[...].astype(jnp.float32)        # [tb, N]
    xmin = xmin_ref[...].astype(jnp.float32)  # [1, N] (same block every step)
    xmax = xmax_ref[...].astype(jnp.float32)  # [1, N]
    X = X_ref[...]                            # [tb, 1] float32
    smin = sums_ref[0]                        # scalar f32 (SMEM)
    smax = sums_ref[1]                        # scalar f32 (SMEM)

    sx = jnp.sum(x, axis=-1, keepdims=True)   # [tb, 1]
    need_up = sx < X                          # [tb, 1]

    denom = jnp.where(need_up, smax - sx, smin - sx)   # [tb, 1]
    r = (X - sx) / denom                               # exact divide on a lane-1 column
    target = jnp.where(need_up, xmax, xmin)            # [tb, N] broadcast select
    out = x + r * (target - x)                         # single fused blend
    out = jnp.where(sx == X, x, out)                   # exact pass-through when feasible
    o_ref[...] = out.astype(o_ref.dtype)


def _repair_kernel_full(x_ref, xmin_ref, xmax_ref, X_ref, o_ref):
    """Per-row bounds: everything tiled along the batch."""
    x = x_ref[...].astype(jnp.float32)
    xmin = xmin_ref[...].astype(jnp.float32)
    xmax = xmax_ref[...].astype(jnp.float32)
    X = X_ref[...]

    sx = jnp.sum(x, axis=-1, keepdims=True)
    smin = jnp.sum(xmin, axis=-1, keepdims=True)
    smax = jnp.sum(xmax, axis=-1, keepdims=True)
    need_up = sx < X

    denom = jnp.where(need_up, smax - sx, smin - sx)
    r = (X - sx) / denom
    target = jnp.where(need_up, xmax, xmin)
    out = x + r * (target - x)
    out = jnp.where(sx == X, x, out)
    o_ref[...] = out.astype(o_ref.dtype)


def hypersimplex_repair(x, xmin, xmax, X, *, tb=None):
    """Project x onto {sum(x)=X, xmin<=x<=xmax} (same blend as the torch module)."""
    B, N = x.shape
    x_dtype = x.dtype
    shared_bounds = (xmin.ndim == 1) and (xmax.ndim == 1)

    # Per-row target as a lane-1 f32 column (accepts shape (B,), (B,1) or scalar).
    X2 = jnp.broadcast_to(jnp.asarray(X, jnp.float32).reshape(-1, 1) if
                          jnp.ndim(X) > 0 else jnp.asarray(X, jnp.float32),
                          (B, 1)).astype(jnp.float32)

    # Adaptive batch tile (rounded to the sublane multiple for the dtype).
    n_streams = 2 if shared_bounds else 4      # (tb, N) HBM streams incl. output
    tb_eff = tb if tb is not None else _pick_tile(B, N, x_dtype.itemsize, n_streams)
    sub = 8 if x_dtype.itemsize >= 4 else (16 if x_dtype.itemsize == 2 else 32)
    tb_eff = max(sub, _round_up(min(tb_eff, _round_up(B, sub)), sub))

    Bp = _round_up(B, tb_eff)
    pad = Bp - B
    if pad:
        # Padded rows: x=0, X=0 -> sum(x) == X -> exact pass-through, sliced off below.
        x = jnp.pad(x, ((0, pad), (0, 0)))
        X2 = jnp.pad(X2, ((0, pad), (0, 0)))
        if not shared_bounds:
            xmin = jnp.pad(xmin, ((0, pad), (0, 0)))
            xmax = jnp.pad(xmax, ((0, pad), (0, 0)))

    grid = (Bp // tb_eff,)
    row_spec = pl.BlockSpec((tb_eff, N), lambda i: (i, 0))
    X_spec = pl.BlockSpec((tb_eff, 1), lambda i: (i, 0))
    out_shape = jax.ShapeDtypeStruct((Bp, N), x_dtype)
    params = pltpu.CompilerParams(dimension_semantics=("parallel",))

    if shared_bounds:
        xmin_row = xmin.reshape(1, N)
        xmax_row = xmax.reshape(1, N)
        sums = jnp.stack([jnp.sum(xmin_row.astype(jnp.float32)),
                          jnp.sum(xmax_row.astype(jnp.float32))])  # (2,) f32 -> SMEM
        bound_spec = pl.BlockSpec((1, N), lambda i: (0, 0))        # resident every step
        smem_spec = pl.BlockSpec(memory_space=pltpu.MemorySpace.SMEM)
        out = pl.pallas_call(
            _repair_kernel_shared,
            out_shape=out_shape,
            grid_spec=pltpu.PrefetchScalarGridSpec(
                num_scalar_prefetch=0,
                grid=grid,
                in_specs=[smem_spec, row_spec, bound_spec, bound_spec, X_spec],
                out_specs=row_spec),
            compiler_params=params,
        )(sums, x, xmin_row, xmax_row, X2)
    else:
        out = pl.pallas_call(
            _repair_kernel_full,
            out_shape=out_shape,
            grid_spec=pltpu.PrefetchScalarGridSpec(
                num_scalar_prefetch=0,
                grid=grid,
                in_specs=[row_spec, row_spec, row_spec, X_spec],
                out_specs=row_spec),
            compiler_params=params,
        )(x, xmin, xmax, X2)

    return out[:B] if pad else out


def _reference(x, xmin, xmax, X):
    """Pure-JAX reference mirroring the torch forward exactly."""
    if xmin.ndim == 1:
        xmin = jnp.broadcast_to(xmin, x.shape)
    if xmax.ndim == 1:
        xmax = jnp.broadcast_to(xmax, x.shape)
    sx = x.sum(-1, keepdims=True)
    Xc = X[:, None]
    r_up = (Xc - sx) / (xmax.sum(-1, keepdims=True) - sx)
    r_dn = (Xc - sx) / (xmin.sum(-1, keepdims=True) - sx)
    up = r_up * xmax + (1 - r_up) * x
    dn = r_dn * xmin + (1 - r_dn) * x
    return jnp.where(sx < Xc, up, jnp.where(sx > Xc, dn, x))


if __name__ == "__main__":
    B, N = 16, 128
    key = jax.random.PRNGKey(0)
    k1, k2, k3, k4 = jax.random.split(key, 4)

    # deterministic synthetic "buffers" (xmin < xmax, X within the feasible range)
    xmin = jax.random.uniform(k1, (N,), jnp.float32, minval=0.0, maxval=0.2)
    xmax = xmin + jax.random.uniform(k2, (N,), jnp.float32, minval=0.5, maxval=1.0)
    x = xmin + (xmax - xmin) * jax.random.uniform(k3, (B, N), jnp.float32)
    # targets: a mix of rows needing up-repair, down-repair, and none
    lo = jnp.sum(jnp.broadcast_to(xmin, (B, N)), -1)
    hi = jnp.sum(jnp.broadcast_to(xmax, (B, N)), -1)
    frac = jax.random.uniform(k4, (B,), jnp.float32)
    X = lo + frac * (hi - lo)
    X = X.at[0].set(jnp.sum(x[0]))  # one row that already satisfies sum(x)=X

    ref = _reference(x, xmin, xmax, X)

    # 1) shared (1-D) bounds path -- the optimized fast path
    out = jax.block_until_ready(hypersimplex_repair(x, xmin, xmax, X))
    np.testing.assert_allclose(np.asarray(out), np.asarray(ref), rtol=1e-5, atol=1e-5)
    np.testing.assert_allclose(np.asarray(out.sum(-1)), np.asarray(X), rtol=1e-4, atol=1e-4)

    # 2) explicit per-row (2-D) bounds path
    xmin2 = jnp.broadcast_to(xmin, (B, N))
    xmax2 = jnp.broadcast_to(xmax, (B, N))
    out2 = jax.block_until_ready(hypersimplex_repair(x, xmin2, xmax2, X))
    np.testing.assert_allclose(np.asarray(out2), np.asarray(ref), rtol=1e-5, atol=1e-5)

    # 3) batch not divisible by the tile -> padded final tile
    Bo = 13
    out3 = jax.block_until_ready(hypersimplex_repair(x[:Bo], xmin, xmax, X[:Bo]))
    np.testing.assert_allclose(np.asarray(out3), np.asarray(ref[:Bo]), rtol=1e-5, atol=1e-5)

    print("KERNEL_OK")
</pallas_src>

<mosaic_0001>
module attributes {stable_mosaic.version = 11 : i64} {
  func.func @_repair_kernel_shared(%arg0: i32, %arg1: memref<2xf32, #tpu.memory_space<smem>>, %arg2: memref<16x128xf32, #tpu.memory_space<vmem>>, %arg3: memref<1x128xf32, #tpu.memory_space<vmem>>, %arg4: memref<1x128xf32, #tpu.memory_space<vmem>>, %arg5: memref<16x1xf32, #tpu.memory_space<vmem>>, %arg6: memref<16x128xf32, #tpu.memory_space<vmem>>) attributes {dimension_semantics = [#tpu.dimension_semantics<parallel>], iteration_bounds = array<i64: 1>, scalar_prefetch = 0 : i64, scratch_operands = 0 : i64, tpu.core_type = #tpu.core_type<tc>, window_params = [{transform_indices = @transform_0, window_bounds = array<i64: 2>}, {transform_indices = @transform_1, window_bounds = array<i64: 16, 128>}, {pipeline_mode = #tpu.pipeline_mode<synchronous>, transform_indices = @transform_2, window_bounds = array<i64: 1, 128>}, {pipeline_mode = #tpu.pipeline_mode<synchronous>, transform_indices = @transform_3, window_bounds = array<i64: 1, 128>}, {transform_indices = @transform_4, window_bounds = array<i64: 16, 1>}, {transform_indices = @transform_5, window_bounds = array<i64: 16, 128>}]} {
    %c0 = arith.constant 0 : index
    %c0_0 = arith.constant 0 : index
    %0 = vector.load %arg2[%c0, %c0_0] : memref<16x128xf32, #tpu.memory_space<vmem>>, vector<16x128xf32>
    %c0_1 = arith.constant 0 : index
    %c0_2 = arith.constant 0 : index
    %1 = vector.load %arg3[%c0_1, %c0_2] : memref<1x128xf32, #tpu.memory_space<vmem>>, vector<1x128xf32>
    %c0_3 = arith.constant 0 : index
    %c0_4 = arith.constant 0 : index
    %2 = vector.load %arg4[%c0_3, %c0_4] : memref<1x128xf32, #tpu.memory_space<vmem>>, vector<1x128xf32>
    %c0_5 = arith.constant 0 : index
    %c0_6 = arith.constant 0 : index
    %3 = vector.load %arg5[%c0_5, %c0_6] : memref<16x1xf32, #tpu.memory_space<vmem>>, vector<16x1xf32>
    %c0_7 = arith.constant 0 : index
    %4 = memref.load %arg1[%c0_7] : memref<2xf32, #tpu.memory_space<smem>>
    %c1 = arith.constant 1 : index
    %5 = memref.load %arg1[%c1] : memref<2xf32, #tpu.memory_space<smem>>
    %cst = arith.constant dense<0.000000e+00> : vector<16xf32>
    %6 = vector.multi_reduction <add>, %0, %cst [1] : vector<16x128xf32> to vector<16xf32>
    %7 = vector.shape_cast %6 : vector<16xf32> to vector<16x1xf32>
    %8 = arith.cmpf olt, %7, %3 : vector<16x1xf32>
    %9 = vector.broadcast %5 : f32 to vector<16x1xf32>
    %10 = arith.subf %9, %7 : vector<16x1xf32>
    %11 = vector.broadcast %4 : f32 to vector<16x1xf32>
    %12 = arith.subf %11, %7 : vector<16x1xf32>
    %13 = arith.select %8, %10, %12 : vector<16x1xi1>, vector<16x1xf32>
    %14 = arith.subf %3, %7 : vector<16x1xf32>
    %15 = arith.divf %14, %13 : vector<16x1xf32>
    %16 = vector.shape_cast %8 : vector<16x1xi1> to vector<16x1xi1>
    %17 = vector.broadcast %16 : vector<16x1xi1> to vector<16x128xi1>
    %18 = vector.shape_cast %2 : vector<1x128xf32> to vector<1x128xf32>
    %19 = vector.broadcast %18 : vector<1x128xf32> to vector<16x128xf32>
    %20 = vector.shape_cast %1 : vector<1x128xf32> to vector<1x128xf32>
    %21 = vector.broadcast %20 : vector<1x128xf32> to vector<16x128xf32>
    %22 = arith.select %17, %19, %21 : vector<16x128xi1>, vector<16x128xf32>
    %23 = arith.subf %22, %0 : vector<16x128xf32>
    %24 = vector.broadcast %15 : vector<16x1xf32> to vector<16x128xf32>
    %25 = arith.mulf %24, %23 : vector<16x128xf32>
    %26 = arith.addf %0, %25 : vector<16x128xf32>
    %27 = arith.cmpf oeq, %7, %3 : vector<16x1xf32>
    %28 = vector.shape_cast %27 : vector<16x1xi1> to vector<16x1xi1>
    %29 = vector.broadcast %28 : vector<16x1xi1> to vector<16x128xi1>
    %30 = arith.select %29, %0, %26 : vector<16x128xi1>, vector<16x128xf32>
    %c0_8 = arith.constant 0 : index
    %c0_9 = arith.constant 0 : index
    %31 = vector.load %arg6[%c0_8, %c0_9] : memref<16x128xf32, #tpu.memory_space<vmem>>, vector<16x128xf32>
    tpu.vector_store %arg6[%c0_8, %c0_9], %30 {strides = array<i32>} : memref<16x128xf32, #tpu.memory_space<vmem>>, vector<16x128xf32>,
    return
  }
  func.func @transform_0(%arg0: i32) -> i32 {
    %c0_i32 = arith.constant 0 : i32
    %c0_i32_0 = arith.constant 0 : i32
    return %c0_i32 : i32
  }
  func.func @transform_1(%arg0: i32) -> (i32, i32) {
    %c0_i32 = arith.constant 0 : i32
    %c0_i32_0 = arith.constant 0 : i32
    return %arg0, %c0_i32 : i32, i32
  }
  func.func @transform_2(%arg0: i32) -> (i32, i32) {
    %c0_i32 = arith.constant 0 : i32
    %c0_i32_0 = arith.constant 0 : i32
    %c0_i32_1 = arith.constant 0 : i32
    return %c0_i32, %c0_i32_0 : i32, i32
  }
  func.func @transform_3(%arg0: i32) -> (i32, i32) {
    %c0_i32 = arith.constant 0 : i32
    %c0_i32_0 = arith.constant 0 : i32
    %c0_i32_1 = arith.constant 0 : i32
    return %c0_i32, %c0_i32_0 : i32, i32
  }
  func.func @transform_4(%arg0: i32) -> (i32, i32) {
    %c0_i32 = arith.constant 0 : i32
    %c0_i32_0 = arith.constant 0 : i32
    return %arg0, %c0_i32 : i32, i32
  }
  func.func @transform_5(%arg0: i32) -> (i32, i32) {
    %c0_i32 = arith.constant 0 : i32
    %c0_i32_0 = arith.constant 0 : i32
    return %arg0, %c0_i32 : i32, i32
  }
}

</mosaic_0001>

<bundles_post_ra>
// kernel: tpu_custom_call.1
= control target key start
LH: loop header
LB: loop body
LE: loop exit
PB: predicated region body
PF: predicated region fallthrough
CT: control target
= control target key end

     0   :  { %10 = vsyncpa [#allocation4], 0  ;;  %s261_s0 = inlined_call_operand.vmem [shape: f32[2], index: 0, kind: input, shape index: {}]   ;;  %s262_s1 = inlined_call_operand.vmem [shape: f32[16,128], index: 1, kind: input, shape index: {}]   ;;  %s263_s2 = inlined_call_operand.vmem [shape: f32[1,128], index: 2, kind: input, shape index: {}]   ;;  %s264_s3 = inlined_call_operand.vmem [shape: f32[1,128], index: 3, kind: input, shape index: {}]   ;;  %s265_s4 = inlined_call_operand.vmem [shape: f32[16,1], index: 4, kind: input, shape index: {}]   ;;  %s266_s5 = inlined_call_operand.hbm [shape: f32[16,128], index: 5, kind: output, shape index: {}]  }
   0x1   :  { %11 = vsyncpa [#allocation3], 0  ;;  %s18_s20 = sshll.u32 %s261_s0, 4  ;;  %s19_s20 = int_to_ptr.vmem [resolvable:$true] %s18_s20 }
   0x2   :  { %s149_s21 = scalar_lea.vmem %s19_s20, 16  ;;  %p154_p1 = scmp.lt.s32.totalorder %s19_s20, %s19_s20 }
   0x3   :  { %p150_p0 = scmp.ne.s32.totalorder %s19_s20, %s149_s21  ;;  %p155_p2 = scmp.lt.s32.totalorder %s149_s21, %s149_s21 }
   0x5   :  { %p156_p3 = por %p155_p2, %p154_p1 }
   0x7   :  { %p157_p4 = pnand %p156_p3, %p150_p0 }
   0x9   :  { %160 = shalt.err (!%p157_p4)
}
   0xa   :  { %s187_s22 = smov [#allocation2]  }
   0xb   :  { %21 = dma.vmem_to_smem %s19_s20, 16, %s187_s22, [#allocation4]  }
   0xc   :  { %183 = dma.done.wait [#allocation4], 16  }
   0xd   :  { %184 = vsyncadd [#allocation4], 4294967280 }
   0xe   :  { %33 = sfence }
   0xf   :  { %v34_v0 = vld [vmem:[%s262_s1] sm:$0xff]  ;;  %v231_v1 = vld [vmem:[%s262_s1 + $0x8] sm:$0xff]  ;;  %v188_v2 = vmov 0   ;;  %s40_s26 = sld [smem:[#allocation2]]  ;;  %s135_s27 = sld [smem:[#allocation2 + $0x1]] }
  0x10   :  { %42 = vadd.xlane.f32.xlu0 %v34_v0  ;;  %143 = vset.pattern.permute.xlu1 %v188_v2  ;;  %v38_v3 = vld [vmem:[%s265_s4] sm:$0xff]  ;;  %v39_v10 = vld [vmem:[%s265_s4 + $0x8] sm:$0xff] }
  0x11   :  { %144 = vset.pattern.permute.xlu0 %v188_v2  ;;  %v137_v26 = vld [vmem:[%s263_s2] ss:$0 sm:$0xff]  ;;  %s189_s2 = smov [#allocation5]  }
  0x12   :  { %v136_v27 = vld [vmem:[%s264_s3] ss:$0 sm:$0xff]  ;;  %s123_s9 = sshll.u32 %s189_s2, 4  ;;  %s124_s9 = int_to_ptr.vmem [resolvable:$true] %s123_s9 }
  0x13   :  { %s161_s3 = scalar_lea.vmem %s124_s9, 256  ;;  %p166_p6 = scmp.lt.s32.totalorder %s124_s9, %s124_s9 }
  0x14   :  { %44 = vadd.xlane.f32.xlu0 %v231_v1  ;;  %p162_p5 = scmp.ne.s32.totalorder %s124_s9, %s161_s3  ;;  %p167_p7 = scmp.lt.s32.totalorder %s161_s3, %s161_s3 }
  0x15   :  { %v48_v4 = vstv %s135_s27  ;;  %v51_v5 = vstv %s40_s26 }
  0x16   :  { %p168_p8 = por %p167_p7, %p166_p6 }
  0x18   :  { %p169_p9 = pnand %p168_p8, %p162_p5 }
  0x9d   :  { %v43_v6 = vpop.xlane.xlu0 %42 }
  0x9e   :  { %vm46_vm0 = vcmp.lt.f32.partialorder %v43_v6, %v38_v3  ;;  %v49_v7 = vsub.f32 %v48_v4, %v43_v6  ;;  %v52_v8 = vsub.f32 %v51_v5, %v43_v6  ;;  %vm102_vm2 = vcmp.eq.f32.partialorder %v43_v6, %v38_v3 }
  0x9f   :  { %v62_v9 = vsel %vm46_vm0, 1, %v188_v2  ;;  %v104_v17 = vsel %vm102_vm2, 1, %v188_v2  ;;  %v56_v18 = vsub.f32 %v38_v3, %v43_v6 }
  0xa0   :  { %65 = vperm.xlu1 %143, %v62_v9   ;;  %v54_v11 = vsel %vm46_vm0, %v49_v7, %v52_v8 }
  0xa1   :  { %145 = vrcp.f32 %v54_v11  ;;  %v45_v12 = vpop.xlane.xlu0 %44 }
  0xa2   :  { %v50_v13 = vsub.f32 %v48_v4, %v45_v12  ;;  %v53_v14 = vsub.f32 %v51_v5, %v45_v12  ;;  %vm47_vm1 = vcmp.lt.f32.partialorder %v45_v12, %v39_v10  ;;  %v57_v21 = vsub.f32 %v39_v10, %v45_v12 }
  0xa3   :  { %v63_v15 = vsel %vm47_vm1, 1, %v188_v2  ;;  %vm103_vm3 = vcmp.eq.f32.partialorder %v45_v12, %v39_v10 }
  0xa4   :  { %68 = vperm.xlu1 %143, %v63_v15   ;;  %v55_v16 = vsel %vm47_vm1, %v50_v13, %v53_v14  ;;  %v105_v24 = vsel %vm103_vm3, 1, %v188_v2 }
  0xa5   :  { %147 = vrcp.f32 %v55_v16 }
  0xa8   :  { %107 = vperm.xlu1 %143, %v104_v17  }
  0xab   :  { %v146_v19 = vpop.eup %145 }
  0xac   :  { %v59_v20 = vmul.f32 %v146_v19, %v56_v18 }
  0xae   :  { %90 = vperm.xlu0 %144, %v59_v20  }
  0xaf   :  { %v148_v22 = vpop.eup %147 }
  0xb0   :  { %v61_v23 = vmul.f32 %v148_v22, %v57_v21 }
  0xb2   :  { %95 = vperm.xlu1 %143, %v61_v23  }
  0xb6   :  { %110 = vperm.xlu1 %143, %v105_v24  }
 0x11f   :  { %v66_v25 = vpop.permute.xlu1 %65 }
 0x120   :  { %vm70_vm4 = vcmp.eq.s32.totalorder %v66_v25, 1 }
 0x121   :  { %v84_v29 = vsel %vm70_vm4, %v136_v27, %v137_v26 }
 0x122   :  { %v86_v30 = vsub.f32 %v84_v29, %v34_v0 }
 0x123   :  { %v69_v28 = vpop.permute.xlu1 %68 }
 0x124   :  { %vm71_vm5 = vcmp.eq.s32.totalorder %v69_v28, 1 }
 0x125   :  { %v85_v31 = vsel %vm71_vm5, %v136_v27, %v137_v26 }
 0x126   :  { %v87_v36 = vsub.f32 %v85_v31, %v231_v1 }
 0x127   :  { %v108_v32 = vpop.permute.xlu1 %107 }
 0x128   :  { %vm112_vm6 = vcmp.eq.s32.totalorder %v108_v32, 1 }
 0x12d   :  { %v91_v33 = vpop.permute.xlu0 %90 }
 0x12e   :  { %v98_v34 = vmul.f32 %v91_v33, %v86_v30 }
 0x130   :  { %v100_v35 = vadd.f32 %v98_v34, %v34_v0 }
 0x131   :  { %v96_v37 = vpop.permute.xlu1 %95 }
 0x132   :  { %v99_v38 = vmul.f32 %v96_v37, %v87_v36  ;;  %v114_v39 = vsel %vm112_vm6, %v34_v0, %v100_v35 }
 0x133   :  { %116 = vst [vmem:[#allocation5] sm:$0xff] %v114_v39 }
 0x134   :  { %v101_v40 = vadd.f32 %v99_v38, %v231_v1 }
 0x135   :  { %v111_v41 = vpop.permute.xlu1 %110 }
 0x136   :  { %vm113_vm7 = vcmp.eq.s32.totalorder %v111_v41, 1 }
 0x137   :  { %v115_v42 = vsel %vm113_vm7, %v231_v1, %v101_v40 }
 0x138   :  { %117 = vst [vmem:[#allocation5 + $0x8] sm:$0xff] %v115_v42 }
 0x139   :  { %172 = shalt.err (!%p169_p9)
}
 0x13a   :  { %s173_s12 = scalar_lea.hbm %s266_s5, 256 }
 0x13b   :  { %p174_p10 = scmp.ne.s32.totalorder %s266_s5, %s173_s12  ;;  %p177_p11 = scmp.lt.u32.totalorder %s173_s12, %s266_s5 }
 0x13d   :  { %p179_p12 = pnand %p177_p11, %p174_p10 }
 0x13f   :  { %182 = shalt.err (!%p179_p12)
}
 0x140   :  { %s190_s17 = smov 128   ;;  %s191_s18 = smov 8  }
 0x141   :  { %129 = dma.vmem_to_hbm [thread:$0]  %s124_s9, 256, %s266_s5, [#allocation3], %s190_s17, %s190_s17, %s191_s18  }
 0x142   :  { %185 = dma.done.wait [#allocation3], 256  }
 0x143   :  { %186 = vsyncadd [#allocation3], 4294967040 }
 0x144   :  { %133 = vsyncpa [#allocation3], 1 }
 0x145   :  { %134 = vsyncpa [#allocation4], 1 }

</bundles_post_ra>
